<compile_context>
chip_gen: v5e
topology: v5e:2x2
jax: 0.10.0
libtpu: 0.0.40
codegen_flags: <defaults>
</compile_context>

<pallas_src>
import jax
import jax.numpy as jnp
from jax.experimental import pallas as pl
from jax.experimental.pallas import tpu as pltpu


def _deconv_mm_kernel(x_ref, w_ref, b_ref, o_ref):
    # x_ref: (Cin, ts), w_ref: (Cout*8, Cin), b_ref: (Cout*8, 1),
    # o_ref: (Cout*8, ts)  -- spatial axis on lanes (lane-dense).
    acc = jnp.dot(w_ref[...], x_ref[...], preferred_element_type=jnp.float32)
    o_ref[...] = (acc + b_ref[...]).astype(o_ref.dtype)


def _choose_spatial_tile(S, target=512):
    # Block last dim must be a multiple of 128 or the full extent.
    if S <= target:
        return S
    return max((target // 128) * 128, 128)


def up_concat_3d(inputs, down_outputs, weight, bias, *, ts_target=512):
    """inputs: (N, Cin, D, H, W); down_outputs: (N, Cskip, 2D, 2H, 2W);
    weight: (Cin, Cout, 2, 2, 2); bias: (Cout,)."""
    N, Cin, D, H, W = inputs.shape
    Cout = weight.shape[1]
    S = D * H * W
    K8 = Cout * 8
    itemsize = jnp.dtype(inputs.dtype).itemsize

    # Channels-first contiguous view: pure reshape, no HBM transpose pass.
    x = inputs.reshape(N, Cin, S)
    # Weight flattened over (co, kd, kh, kw) then transposed -> rows = K8.
    w_t = weight.reshape(Cin, K8).T                      # (K8, Cin), tiny
    # Bias per output channel, repeated across the 8 kernel offsets.
    b2 = jnp.repeat(bias, 8).reshape(K8, 1)

    ts = _choose_spatial_tile(S, ts_target)
    grid = (N, pl.cdiv(S, ts))

    y = pl.pallas_call(
        _deconv_mm_kernel,
        out_shape=jax.ShapeDtypeStruct((N, K8, S), inputs.dtype),
        grid_spec=pltpu.PrefetchScalarGridSpec(
            num_scalar_prefetch=0,
            grid=grid,
            in_specs=[
                pl.BlockSpec((None, Cin, ts), lambda n, j: (n, 0, j)),
                pl.BlockSpec((K8, Cin), lambda n, j: (0, 0)),
                pl.BlockSpec((K8, 1), lambda n, j: (0, 0)),
            ],
            out_specs=pl.BlockSpec((None, K8, ts), lambda n, j: (n, 0, j)),
        ),
        compiler_params=pltpu.CompilerParams(
            dimension_semantics=("parallel", "parallel"),
            vmem_limit_bytes=32 * 1024 * 1024,
        ),
        cost_estimate=pl.CostEstimate(
            flops=2 * N * S * Cin * K8,
            transcendentals=0,
            bytes_accessed=(N * Cin * S + K8 * Cin + K8 + N * K8 * S) * itemsize,
        ),
    )(x, w_t, b2)

    # (N, K8, S) -> (N, Cout, kd, kh, kw, D, H, W)
    #            -> (N, Cout, D, kd, H, kh, W, kw) -> (N, Cout, 2D, 2H, 2W)
    y = y.reshape(N, Cout, 2, 2, 2, D, H, W)
    y = jnp.transpose(y, (0, 1, 5, 2, 6, 3, 7, 4)).reshape(
        N, Cout, 2 * D, 2 * H, 2 * W)

    # torch.cat([down_outputs, outputs], dim=1)
    return jnp.concatenate([down_outputs, y], axis=1)


def _reference(inputs, down_outputs, weight, bias):
    # pure-JAX reference: direct einsum form of ConvTranspose3d(k=2, s=2)
    N, Cin, D, H, W = inputs.shape
    Cout = weight.shape[1]
    y = jnp.einsum("ncdhw,coijk->ndhwoijk", inputs, weight) + bias[
        None, None, None, None, :, None, None, None]
    y = jnp.transpose(y, (0, 4, 1, 5, 2, 6, 3, 7)).reshape(
        N, Cout, 2 * D, 2 * H, 2 * W).astype(inputs.dtype)
    return jnp.concatenate([down_outputs, y], axis=1)


if __name__ == "__main__":
    key = jax.random.PRNGKey(0)
    k1, k2, k3, k4 = jax.random.split(key, 4)

    N, Cin, Cout = 2, 8, 4
    D = H = W = 4

    inputs = jax.random.normal(k1, (N, Cin, D, H, W), dtype=jnp.float32)
    down_outputs = jax.random.normal(
        k2, (N, Cout, 2 * D, 2 * H, 2 * W), dtype=jnp.float32)
    # ConvTranspose3d weight layout: (in_ch, out_ch, 2, 2, 2)
    weight = 0.1 * jax.random.normal(k3, (Cin, Cout, 2, 2, 2), dtype=jnp.float32)
    bias = 0.1 * jax.random.normal(k4, (Cout,), dtype=jnp.float32)

    out = up_concat_3d(inputs, down_outputs, weight, bias)
    out = jax.block_until_ready(out)

    ref = _reference(inputs, down_outputs, weight, bias)
    assert out.shape == (N, 2 * Cout, 2 * D, 2 * H, 2 * W), out.shape
    assert jnp.allclose(out, ref, atol=1e-5, rtol=1e-5)

    print("KERNEL_OK")
</pallas_src>

<mosaic_0001>
module attributes {stable_mosaic.version = 11 : i64} {
  func.func @_deconv_mm_kernel(%arg0: i32, %arg1: i32, %arg2: memref<1x8x64xf32, #tpu.memory_space<vmem>>, %arg3: memref<32x8xf32, #tpu.memory_space<vmem>>, %arg4: memref<32x1xf32, #tpu.memory_space<vmem>>, %arg5: memref<1x32x64xf32, #tpu.memory_space<vmem>>) attributes {dimension_semantics = [#tpu.dimension_semantics<parallel>, #tpu.dimension_semantics<parallel>], iteration_bounds = array<i64: 2, 1>, scalar_prefetch = 0 : i64, scratch_operands = 0 : i64, tpu.core_type = #tpu.core_type<tc>, window_params = [{transform_indices = @transform_0, window_bounds = array<i64: 1, 8, 64>}, {pipeline_mode = #tpu.pipeline_mode<synchronous>, transform_indices = @transform_1, window_bounds = array<i64: 32, 8>}, {pipeline_mode = #tpu.pipeline_mode<synchronous>, transform_indices = @transform_2, window_bounds = array<i64: 32, 1>}, {transform_indices = @transform_3, window_bounds = array<i64: 1, 32, 64>}]} {
    %c0 = arith.constant 0 : index
    %c0_0 = arith.constant 0 : index
    %0 = vector.load %arg3[%c0, %c0_0] : memref<32x8xf32, #tpu.memory_space<vmem>>, vector<32x8xf32>
    %c0_1 = arith.constant 0 : index
    %c0_2 = arith.constant 0 : index
    %c0_3 = arith.constant 0 : index
    %1 = vector.load %arg2[%c0_1, %c0_2, %c0_3] : memref<1x8x64xf32, #tpu.memory_space<vmem>>, vector<1x8x64xf32>
    %2 = vector.shape_cast %1 : vector<1x8x64xf32> to vector<8x64xf32>
    %cst = arith.constant dense<0.000000e+00> : vector<32x64xf32>
    %3 = tpu.matmul %0, %2, %cst {dimension_numbers = #tpu.dot_dimension_numbers<[1], [0], [0], [1], [0, 0, 1, 1], [], []>} : vector<32x8xf32>, vector<8x64xf32>, vector<32x64xf32> -> vector<32x64xf32>
    %c0_4 = arith.constant 0 : index
    %c0_5 = arith.constant 0 : index
    %4 = vector.load %arg4[%c0_4, %c0_5] : memref<32x1xf32, #tpu.memory_space<vmem>>, vector<32x1xf32>
    %5 = vector.broadcast %4 : vector<32x1xf32> to vector<32x64xf32>
    %6 = arith.addf %3, %5 : vector<32x64xf32>
    %c0_6 = arith.constant 0 : index
    %c0_7 = arith.constant 0 : index
    %c0_8 = arith.constant 0 : index
    %7 = vector.load %arg5[%c0_6, %c0_7, %c0_8] : memref<1x32x64xf32, #tpu.memory_space<vmem>>, vector<1x32x64xf32>
    %8 = vector.shape_cast %7 : vector<1x32x64xf32> to vector<32x64xf32>
    %9 = vector.shape_cast %6 : vector<32x64xf32> to vector<1x32x64xf32>
    tpu.vector_store %arg5[%c0_6, %c0_7, %c0_8], %9 {strides = array<i32>} : memref<1x32x64xf32, #tpu.memory_space<vmem>>, vector<1x32x64xf32>,
    return
  }
  func.func @transform_0(%arg0: i32, %arg1: i32) -> (i32, i32, i32) {
    %c0_i32 = arith.constant 0 : i32
    %c0_i32_0 = arith.constant 0 : i32
    return %arg0, %c0_i32, %arg1 : i32, i32, i32
  }
  func.func @transform_1(%arg0: i32, %arg1: i32) -> (i32, i32) {
    %c0_i32 = arith.constant 0 : i32
    %c0_i32_0 = arith.constant 0 : i32
    %c0_i32_1 = arith.constant 0 : i32
    return %c0_i32, %c0_i32_0 : i32, i32
  }
  func.func @transform_2(%arg0: i32, %arg1: i32) -> (i32, i32) {
    %c0_i32 = arith.constant 0 : i32
    %c0_i32_0 = arith.constant 0 : i32
    %c0_i32_1 = arith.constant 0 : i32
    return %c0_i32, %c0_i32_0 : i32, i32
  }
  func.func @transform_3(%arg0: i32, %arg1: i32) -> (i32, i32, i32) {
    %c0_i32 = arith.constant 0 : i32
    %c0_i32_0 = arith.constant 0 : i32
    return %arg0, %c0_i32, %arg1 : i32, i32, i32
  }
}

</mosaic_0001>

<bundles_post_ra>
// kernel: tpu_custom_call.1
= control target key start
LH: loop header
LB: loop body
LE: loop exit
PB: predicated region body
PF: predicated region fallthrough
CT: control target
= control target key end

     0   :  { %8 = vsyncpa [#allocation3], 0  ;;  %s667_s0 = inlined_call_operand.vmem [shape: f32[2,8,64], index: 0, kind: input, shape index: {}]   ;;  %s668_s1 = inlined_call_operand.vmem [shape: f32[32,8], index: 1, kind: input, shape index: {}]   ;;  %s669_s2 = inlined_call_operand.vmem [shape: f32[32,1], index: 2, kind: input, shape index: {}]   ;;  %s670_s3 = inlined_call_operand.hbm [shape: f32[2,32,64], index: 3, kind: output, shape index: {}]  }
   0x1   :  { %10 = vsyncpa [#allocation3 + $0x1], 0  ;;  %s542_s12 = smov 0   ;;  %s544_s13 = smov 0  }
   0x2   :  { %s546_s14 = smov 0   ;;  %s548_s15 = smov 0  }
   0x3   :  { %s550_s16 = smov 0   ;;  %s552_s17 = smov 0  }
   0x4 LB: > { %s359_s18 = sadd.s32 4294967295, %s517_s17   ;;  %s360_s19 = sadd.s32 4294967294, %s517_s17   ;;  %s517_s17 = sphi %s552_s17, %s16_s17   ;;  %s513_s16 = sphi %s550_s16, %s677_s16   ;;  %s509_s15 = sphi %s548_s15, %s676_s15   ;;  %s505_s14 = sphi %s546_s14, %s675_s14   ;;  %s501_s13 = sphi %s544_s13, %s674_s13   ;;  %s497_s12 = sphi %s542_s12, %s673_s12  }
   0x5   : > { %s28_s20 = sadd.s32 1, %s513_s16  ;;  %s107_s21 = sadd.s32 1, %s505_s14 }
   0x6   : > { %p30_p0 = scmp.ge.s32.totalorder %s28_s20, 2  ;;  %p117_p1 = scmp.ne.s32.totalorder %s505_s14, %s501_s13 }
   0x7   : > { %p118_p2 = scmp.eq.s32.totalorder %s359_s18, 1  ;;  %p123_p3 = scmp.ne.s32.totalorder %s501_s13, %s497_s12 }
   0x8   : > { %s679_s20 = smov (%p30_p0, %s28_s20), 0  ;;  %p124_p5 = scmp.eq.s32.totalorder %s360_s19, 1 }
   0x9   : > { %p582_p4 = por %p118_p2, %p117_p1  ;;  %s102_s23 = ssub.s32 %s513_s16, %s679_s20 }
   0xa   : > { %p363_p6 = scmp.ge.s32.totalorder %s517_s17, 1  ;;  %p105_p7 = scmp.eq.s32.totalorder %s102_s23, 0 }
   0xb   : > { %p589_p8 = por %p124_p5, %p123_p3  ;;  %p158_p9 = scmp.lt.s32.totalorder %s517_s17, 3 }
   0xc   : > { %s595_s25 = scalar_select %p105_p7, %s505_s14, %s107_s21  }
   0xd   : > { %p159_p10 = pnand %p363_p6, %p158_p9 }
   0xe   : > { %p184_p11 = scmp.lt.s32.totalorder (!%p159_p10), %s509_s15, 1  ;;  %s375_s5 = sshll.u32 (!%p159_p10), %s509_s15, 5 }
   0xf   : > { %162 = sbr.rel (%p159_p10) target bundleno = 167 (0xa7), region = 32  ;;  %s280_s8 = scalar_lea.hbm (!%p159_p10), %s670_s3, %s375_s5 }
  0x10   : > { %s283_s11 = sshll.u32 (!%p159_p10), %s280_s8, 4  ;;  %s459_s26 = scalar_lea.hbm (!%p159_p10), %s670_s3, 64  ;;  %s284_s11 = int_to_ptr.hbm [resolvable:$true] %s283_s11 }
  0x11   : > { %s453_s18 = sshra.s32 (!%p159_p10), %s284_s11, 4  ;;  %s454_s18 = int_to_ptr.hbm [resolvable:$true] %s453_s18 }
  0x12   : > { %s455_s19 = scalar_lea.hbm (!%p159_p10), %s454_s18, 32  ;;  %p460_p1 = scmp.lt.s32.totalorder (!%p159_p10), %s454_s18, %s670_s3 }
  0x13   : > { %p456_p12 = scmp.ne.s32.totalorder (!%p159_p10), %s454_s18, %s455_s19  ;;  %p461_p2 = scmp.lt.s32.totalorder (!%p159_p10), %s459_s26, %s455_s19 }
  0x14   : > { %v519_v0 = vmov 0   ;;  %v198_v1 = vld [vmem:[%s669_s2 + $0x10] sm:$0xff]  ;;  %v196_v2 = vld [vmem:[%s669_s2] sm:$0xff]  ;;  %s185_s30 = scalar_select %p184_p11, %s509_s15, 1  ;;  %vm220_vm0 = vcmask 64512   ;;  %v192_v5 = vld [vmem:[%s668_s1 + $0x8] sm:$0xff] }
  0x15   : > { %438 = vset.pattern.permute.xlu1 %v519_v0  ;;  %437 = vset.pattern.permute.xlu0 %v519_v0  ;;  %v191_v4 = vld [vmem:[%s668_s1] sm:$0xff]  ;;  %v193_v6 = vld [vmem:[%s668_s1 + $0x10] sm:$0xff]  ;;  %v194_v7 = vld [vmem:[%s668_s1 + $0x18] sm:$0xff]  ;;  %vm262_vm1 = vcmask 523264   ;;  %p457_p13 = pnand %p456_p12, %p582_p4  ;;  %p462_p3 = por %p461_p2, %p460_p1 }
  0x16   : > { %212 = vperm.xlu1 %438, %v198_v1   ;;  %202 = vperm.xlu0 %437, %v196_v2   ;;  %s365_s4 = sshll.u32 %s185_s30, 3  ;;  %v199_v8 = vld [vmem:[%s669_s2 + $0x18] sm:$0xff]  ;;  %v197_v9 = vld [vmem:[%s669_s2 + $0x8] sm:$0xff]  ;;  %s181_s30 = sand.u32 1, %s501_s13  }
  0x17   : > { %s190_s7 = scalar_lea.vmem %s667_s0, %s365_s4  ;;  %s364_s4 = sshll.u32 %s181_s30, 5 }
  0x18   : > { %v195_v3 = vld [vmem:[%s190_s7] sm:$0xff]  ;;  %s183_s9 = scalar_lea.vmem [#allocation2], %s364_s4  ;;  %s268_s15 = scalar_lea.sflag [#allocation3], %s181_s30 }
  0x19   : > { %248 = vmatpush.msra.mxu0 %v195_v3  ;;  %376 = vmatpush.msra.mxu1 %v195_v3  ;;  %s281_s10 = sshll.u32 %s183_s9, 4  ;;  %p458_p0 = pneg %p457_p13  ;;  %s282_s10 = int_to_ptr.vmem [resolvable:$true] %s281_s10 }
  0x1a   : > { %377 = vmatpush.msra.mxu2 %v195_v3  ;;  %378 = vmatpush.msra.mxu3 %v195_v3 }
  0x1b   : > { %366 = vmatmul.msk.f32.vlgmr.msra.gmra.mxu0 %vm220_vm0, %v191_v4  ;;  %367 = vmatmul.msk.f32.vlgmr.msra.gmra.mxu1 %vm220_vm0, %v192_v5  ;;  %p463_p5 = pnand %p462_p3, %p458_p0 }
  0x1c   : > { %368 = vmatmul.msk.f32.vlgmr.msra.gmra.mxu2 %vm220_vm0, %v193_v6  ;;  %369 = vmatmul.msk.f32.vlgmr.msra.gmra.mxu3 %vm220_vm0, %v194_v7 }
  0x1e   : > { %217 = vperm.xlu1 %438, %v199_v8   ;;  %207 = vperm.xlu0 %437, %v197_v9  }
  0x88   : > { %v203_v10 = vpop.permute.xlu0 %202  ;;  %v213_v11 = vpop.permute.xlu1 %212 }
  0x90   : > { %v208_v12 = vpop.permute.xlu0 %207  ;;  %v218_v17 = vpop.permute.xlu1 %217 }
  0x98   : > { %v250_v13 = vpop.f32.mrf.mxu0  ;;  %v253_v14 = vpop.f32.mrf.mxu1 }
  0x99   : > { %v251_v15 = vadd.f32 %v250_v13, %v203_v10  ;;  %v254_v16 = vadd.f32 %v253_v14, %v208_v12 }
  0x9b   : > { %263 = vst.msk [vmem:[%s183_s9] sm:$0xff] %vm262_vm1, %v251_v15 }
  0x9c   : > { %264 = vst.msk [vmem:[%s183_s9 + $0x8] sm:$0xff] %vm262_vm1, %v254_v16 }
  0x9f   : > { %v256_v18 = vpop.f32.mrf.mxu2  ;;  %v259_v19 = vpop.f32.mrf.mxu3 }
  0xa0   : > { %v257_v20 = vadd.f32 %v256_v18, %v213_v11  ;;  %v260_v21 = vadd.f32 %v259_v19, %v218_v17 }
  0xa2   : > { %265 = vst.msk [vmem:[%s183_s9 + $0x10] sm:$0xff] %vm262_vm1, %v257_v20 }
  0xa3   : > { %266 = vst.msk [vmem:[%s183_s9 + $0x18] sm:$0xff] %vm262_vm1, %v260_v21 }
  0xa4   : > { %466 = shalt.err (!%p463_p5)
}
  0xa5   : > { %s520_s29 = smov 128   ;;  %s521_s30 = smov 8  }
  0xa6   : > { %379 = dma.vmem_to_hbm [thread:$0]  (%p582_p4), %s282_s10, 512, %s284_s11, %s268_s15, %s520_s29, %s520_s29, %s521_s30  }
  0xa7 PF: > { %p385_p6 = scmp.ge.s32.totalorder %s517_s17, 2  ;;  %s298_s4 = sand.u32 1, %s497_s12  }
  0xa8   : > { %s299_s5 = scalar_lea.sflag [#allocation3], %s298_s4 }
  0xa9   : > { %p382_p7 = pnand %p385_p6, %p589_p8 }
  0xab   : > { %p383_p9 = pneg %p382_p7 }
  0xad   : > { %492 = dma.done.wait (%p383_p9), %s299_s5, 512  }
  0xae   : > { %494 = vsyncadd (%p383_p9), %s299_s5, 4294966784  ;;  %s16_s17 = sadd.s32 1, %s517_s17   ;;  %s673_s12 = smov %s501_s13 }
  0xaf   : > { %p13_p10 = scmp.ge.s32.totalorder %s16_s17, 4   ;;  %s674_s13 = smov %s505_s14 }
  0xb0   : > { %s675_s14 = smov %s595_s25  ;;  %s676_s15 = smov %s513_s16 }
  0xb1   : > { %s677_s16 = smov %s679_s20  ;;  %15 = sbr.rel (!%p13_p10) target bundleno = 4 (0x4), region = 67 }
  0xb6   :  { %305 = vsyncpa [#allocation3], 1 }
  0xb7   :  { %307 = vsyncpa [#allocation3 + $0x1], 1 }

</bundles_post_ra>
